<compile_context>
chip_gen: v5e
topology: v5e:2x2
jax: 0.10.0
libtpu: 0.0.40
codegen_flags: <defaults>
</compile_context>

<pallas_src>
import functools

import jax
import jax.numpy as jnp
from jax.experimental import pallas as pl
from jax.experimental.pallas import tpu as pltpu


# -----------------------------------------------------------------------------
# helpers
# -----------------------------------------------------------------------------
def _pick_tile(dim, align, target):
    """Largest multiple of `align` that divides `dim` and is <= `target`.

    Falls back to the full dimension when `dim` is not `align`-aligned
    (a full-extent block is always legal)."""
    if dim % align != 0:
        return dim
    t = min((target // align) * align, dim)
    t = max(t, align)
    while dim % t != 0:
        t -= align
    return t


# -----------------------------------------------------------------------------
# 1) ScalingLayer:  (x - shift) * (1/scale), per-channel
# -----------------------------------------------------------------------------
def _scaling_kernel(shift_ref, inv_scale_ref, x_ref, o_ref):
    # shift_ref / inv_scale_ref: (TR, 1) f32, one value per (n, c) row.
    # x_ref / o_ref:             (TR, TP), TP a multiple of 128 (lane-dense).
    x = x_ref[...].astype(jnp.float32)
    o_ref[...] = ((x - shift_ref[...]) * inv_scale_ref[...]).astype(o_ref.dtype)


def scaling_layer(x, shift, scale, *, row_tile=256, lane_tile=2048):
    """Applies (x - shift) / scale with per-channel shift/scale (NCHW layout).

    Args:
      x:     (N, C, H, W) array.
      shift: (C,) float32.
      scale: (C,) float32.
    Returns:
      (N, C, H, W) array, same dtype as x.
    """
    N, C, H, W = x.shape
    assert shift.shape == (C,) and scale.shape == (C,)

    R, P = N * C, H * W
    x2d = x.reshape(R, P)                         # lane-dense layout, free view

    shift_f32 = shift.astype(jnp.float32)
    inv_scale_f32 = 1.0 / scale.astype(jnp.float32)      # reciprocal once, in wrapper
    shift_rows = jnp.tile(shift_f32, N).reshape(R, 1)
    inv_scale_rows = jnp.tile(inv_scale_f32, N).reshape(R, 1)

    TR = _pick_tile(R, 8, row_tile)               # multiple of 8 (or full R)
    TP = _pick_tile(P, 128, lane_tile)            # multiple of 128 (or full P)
    grid = (R // TR, P // TP)

    # Pipelined VMEM: 2 buffers x (in + out) x block  (+ tiny shift/scale rows)
    # <= ~8 MiB with the default tile targets -> comfortably under the 32 MiB
    # limit on every generation (v5e scoped default 16 MiB, v7x physical 64 MiB).
    vmem_limit = 32 * 1024 * 1024

    out2d = pl.pallas_call(
        _scaling_kernel,
        out_shape=jax.ShapeDtypeStruct((R, P), x.dtype),
        grid=grid,
        in_specs=[
            pl.BlockSpec((TR, 1), lambda i, j: (i, 0)),
            pl.BlockSpec((TR, 1), lambda i, j: (i, 0)),
            pl.BlockSpec((TR, TP), lambda i, j: (i, j)),
        ],
        out_specs=pl.BlockSpec((TR, TP), lambda i, j: (i, j)),
        compiler_params=pltpu.CompilerParams(
            dimension_semantics=("parallel", "parallel"),
            vmem_limit_bytes=vmem_limit,
        ),
    )(shift_rows, inv_scale_rows, x2d)

    return out2d.reshape(N, C, H, W)


# -----------------------------------------------------------------------------
# 2) LPIPS per-layer distance (normalize + sq-diff + 1x1 conv + spatial mean)
# -----------------------------------------------------------------------------
def _lpips_layer_kernel(f0_ref, f1_ref, w_ref, o_ref, *, inv_p):
    # f0_ref / f1_ref: (C, TP)   w_ref: (C, 1)   o_ref: (1, 1) accumulator
    j = pl.program_id(1)

    @pl.when(j == 0)
    def _():
        o_ref[...] = jnp.zeros_like(o_ref)

    f0 = f0_ref[...].astype(jnp.float32)
    f1 = f1_ref[...].astype(jnp.float32)
    eps = jnp.float32(1e-10)
    # normalize_tensor: x / (sqrt(sum_c x^2) + eps); divide only on the (1,TP)
    # norm row, then broadcast-multiply.
    inv_n0 = 1.0 / (jnp.sqrt(jnp.sum(f0 * f0, axis=0, keepdims=True)) + eps)
    inv_n1 = 1.0 / (jnp.sqrt(jnp.sum(f1 * f1, axis=0, keepdims=True)) + eps)
    d = f0 * inv_n0 - f1 * inv_n1
    # 1x1 conv (no bias) + spatial mean, accumulated over spatial tiles.
    contrib = jnp.sum(d * d * w_ref[...]) * inv_p
    o_ref[...] += contrib


def lpips_layer_distance(f0, f1, lin_weight, *, lane_tile=512):
    """spatial_average(lin((normalize(f0) - normalize(f1))**2)) for one layer.

    Args:
      f0, f1:     (N, C, H, W) feature maps.
      lin_weight: (C,) NetLinLayer 1x1-conv weight (no bias).
    Returns:
      (N, 1, 1, 1) float32, matching the PyTorch res[kk] shape.
    """
    N, C, H, W = f0.shape
    assert f1.shape == f0.shape and lin_weight.shape == (C,)
    P = H * W
    TP = _pick_tile(P, 128, lane_tile)
    grid = (N, P // TP)

    f0r = f0.reshape(N, C, P)
    f1r = f1.reshape(N, C, P)
    w2 = lin_weight.astype(jnp.float32).reshape(C, 1)

    kernel = functools.partial(_lpips_layer_kernel, inv_p=1.0 / P)
    out = pl.pallas_call(
        kernel,
        out_shape=jax.ShapeDtypeStruct((N, 1, 1), jnp.float32),
        grid=grid,
        in_specs=[
            pl.BlockSpec((pl.Squeezed(), C, TP), lambda n, j: (n, 0, j)),
            pl.BlockSpec((pl.Squeezed(), C, TP), lambda n, j: (n, 0, j)),
            pl.BlockSpec((C, 1), lambda n, j: (0, 0)),
        ],
        out_specs=pl.BlockSpec((pl.Squeezed(), 1, 1), lambda n, j: (n, 0, 0)),
        compiler_params=pltpu.CompilerParams(
            dimension_semantics=("parallel", "arbitrary"),
        ),
    )(f0r, f1r, w2)
    return out.reshape(N, 1, 1, 1)


# -----------------------------------------------------------------------------
# 3) hinge discriminator loss
# -----------------------------------------------------------------------------
def _hinge_kernel(real_ref, fake_ref, o_ref, *, inv_nr, inv_nf):
    lr = jnp.sum(jnp.maximum(1.0 - real_ref[...], 0.0)) * inv_nr
    lf = jnp.sum(jnp.maximum(1.0 + fake_ref[...], 0.0)) * inv_nf
    o_ref[0] = 0.5 * (lr + lf)


def hinge_d_loss(logits_real, logits_fake):
    """0.5 * (mean(relu(1 - real)) + mean(relu(1 + fake))) -> scalar."""
    r2 = logits_real.reshape(logits_real.shape[0], -1).astype(jnp.float32)
    f2 = logits_fake.reshape(logits_fake.shape[0], -1).astype(jnp.float32)
    kernel = functools.partial(_hinge_kernel, inv_nr=1.0 / r2.size, inv_nf=1.0 / f2.size)
    out = pl.pallas_call(
        kernel,
        out_shape=jax.ShapeDtypeStruct((1,), jnp.float32),
        in_specs=[
            pl.BlockSpec(memory_space=pltpu.MemorySpace.VMEM),
            pl.BlockSpec(memory_space=pltpu.MemorySpace.VMEM),
        ],
        out_specs=pl.BlockSpec(memory_space=pltpu.MemorySpace.SMEM),
    )(r2, f2)
    return out[0]


# -----------------------------------------------------------------------------
# reference implementations (plain JAX, mirror the PyTorch code)
# -----------------------------------------------------------------------------
def _lpips_layer_distance_ref(f0, f1, w):
    eps = 1e-10
    n0 = jnp.sqrt(jnp.sum(f0 * f0, axis=1, keepdims=True))
    n1 = jnp.sqrt(jnp.sum(f1 * f1, axis=1, keepdims=True))
    d = (f0 / (n0 + eps) - f1 / (n1 + eps)) ** 2
    lin = jnp.sum(d * w[None, :, None, None], axis=1, keepdims=True)
    return jnp.mean(lin, axis=(2, 3), keepdims=True)


if __name__ == "__main__":
    key = jax.random.PRNGKey(0)
    k1, k2, k3, k4, k5, k6, k7 = jax.random.split(key, 7)

    # --- ScalingLayer (module buffers: 2 channels) ------------------------
    shift = jnp.array([-0.030, -0.088], dtype=jnp.float32)
    scale = jnp.array([0.458, 0.448], dtype=jnp.float32)

    x = jax.random.normal(k1, (2, 2, 16, 16), dtype=jnp.float32)
    out = jax.block_until_ready(scaling_layer(x, shift, scale))
    ref = (x - shift[None, :, None, None]) / scale[None, :, None, None]
    assert out.shape == x.shape and out.dtype == x.dtype
    assert jnp.allclose(out, ref, rtol=1e-5, atol=1e-6)

    # Larger input exercising the (row, lane) tiling path.
    x_big = jax.random.normal(k2, (4, 2, 64, 128), dtype=jnp.float32)
    out_big = jax.block_until_ready(scaling_layer(x_big, shift, scale))
    ref_big = (x_big - shift[None, :, None, None]) / scale[None, :, None, None]
    assert jnp.allclose(out_big, ref_big, rtol=1e-5, atol=1e-6)

    # --- LPIPS per-layer distance (fused) ---------------------------------
    f0 = jax.random.normal(k3, (2, 4, 32, 32), dtype=jnp.float32)
    f1 = jax.random.normal(k4, (2, 4, 32, 32), dtype=jnp.float32)
    w = jnp.abs(jax.random.normal(k5, (4,), dtype=jnp.float32))
    dist = jax.block_until_ready(lpips_layer_distance(f0, f1, w))
    dist_ref = _lpips_layer_distance_ref(f0, f1, w)
    assert dist.shape == (2, 1, 1, 1)
    assert jnp.allclose(dist, dist_ref, rtol=1e-5, atol=1e-6)

    # --- hinge discriminator loss ------------------------------------------
    logits_real = jax.random.normal(k6, (2, 1, 8, 8), dtype=jnp.float32)
    logits_fake = jax.random.normal(k7, (2, 1, 8, 8), dtype=jnp.float32)
    hl = jax.block_until_ready(hinge_d_loss(logits_real, logits_fake))
    hl_ref = 0.5 * (jnp.mean(jnp.maximum(1.0 - logits_real, 0.0))
                    + jnp.mean(jnp.maximum(1.0 + logits_fake, 0.0)))
    assert jnp.allclose(hl, hl_ref, rtol=1e-5, atol=1e-6)

    print("KERNEL_OK")
</pallas_src>

<mosaic_0001>
module attributes {stable_mosaic.version = 11 : i64} {
  func.func @_scaling_kernel(%arg0: i32, %arg1: i32, %arg2: memref<4x1xf32, #tpu.memory_space<vmem>>, %arg3: memref<4x1xf32, #tpu.memory_space<vmem>>, %arg4: memref<4x256xf32, #tpu.memory_space<vmem>>, %arg5: memref<4x256xf32, #tpu.memory_space<vmem>>) attributes {dimension_semantics = [#tpu.dimension_semantics<parallel>, #tpu.dimension_semantics<parallel>], iteration_bounds = array<i64: 1, 1>, scalar_prefetch = 0 : i64, scratch_operands = 0 : i64, tpu.core_type = #tpu.core_type<tc>, window_params = [{transform_indices = @transform_0, window_bounds = array<i64: 4, 1>}, {transform_indices = @transform_1, window_bounds = array<i64: 4, 1>}, {transform_indices = @transform_2, window_bounds = array<i64: 4, 256>}, {transform_indices = @transform_3, window_bounds = array<i64: 4, 256>}]} {
    %c0 = arith.constant 0 : index
    %c0_0 = arith.constant 0 : index
    %0 = vector.load %arg4[%c0, %c0_0] : memref<4x256xf32, #tpu.memory_space<vmem>>, vector<4x256xf32>
    %c0_1 = arith.constant 0 : index
    %c0_2 = arith.constant 0 : index
    %1 = vector.load %arg2[%c0_1, %c0_2] : memref<4x1xf32, #tpu.memory_space<vmem>>, vector<4x1xf32>
    %2 = vector.broadcast %1 : vector<4x1xf32> to vector<4x256xf32>
    %3 = arith.subf %0, %2 : vector<4x256xf32>
    %c0_3 = arith.constant 0 : index
    %c0_4 = arith.constant 0 : index
    %4 = vector.load %arg3[%c0_3, %c0_4] : memref<4x1xf32, #tpu.memory_space<vmem>>, vector<4x1xf32>
    %5 = vector.broadcast %4 : vector<4x1xf32> to vector<4x256xf32>
    %6 = arith.mulf %3, %5 : vector<4x256xf32>
    %c0_5 = arith.constant 0 : index
    %c0_6 = arith.constant 0 : index
    %7 = vector.load %arg5[%c0_5, %c0_6] : memref<4x256xf32, #tpu.memory_space<vmem>>, vector<4x256xf32>
    tpu.vector_store %arg5[%c0_5, %c0_6], %6 {strides = array<i32>} : memref<4x256xf32, #tpu.memory_space<vmem>>, vector<4x256xf32>,
    return
  }
  func.func @transform_0(%arg0: i32, %arg1: i32) -> (i32, i32) {
    %c0_i32 = arith.constant 0 : i32
    %c0_i32_0 = arith.constant 0 : i32
    return %arg0, %c0_i32 : i32, i32
  }
  func.func @transform_1(%arg0: i32, %arg1: i32) -> (i32, i32) {
    %c0_i32 = arith.constant 0 : i32
    %c0_i32_0 = arith.constant 0 : i32
    return %arg0, %c0_i32 : i32, i32
  }
  func.func @transform_2(%arg0: i32, %arg1: i32) -> (i32, i32) {
    %c0_i32 = arith.constant 0 : i32
    return %arg0, %arg1 : i32, i32
  }
  func.func @transform_3(%arg0: i32, %arg1: i32) -> (i32, i32) {
    %c0_i32 = arith.constant 0 : i32
    return %arg0, %arg1 : i32, i32
  }
}

</mosaic_0001>

<bundles_post_ra>
// kernel: tpu_custom_call.1
= control target key start
LH: loop header
LB: loop body
LE: loop exit
PB: predicated region body
PF: predicated region fallthrough
CT: control target
= control target key end

     0   :  { %v85_v1 = vmov 0   ;;  %s120_s0 = inlined_call_operand.vmem [shape: f32[4,1], index: 0, kind: input, shape index: {}]   ;;  %s121_s1 = inlined_call_operand.vmem [shape: f32[4,1], index: 1, kind: input, shape index: {}]   ;;  %s122_s2 = inlined_call_operand.vmem [shape: f32[4,256], index: 2, kind: input, shape index: {}]   ;;  %s123_s3 = inlined_call_operand.hbm [shape: f32[4,256], index: 3, kind: output, shape index: {}]  }
   0x1   :  { %v16_v0 = vld [vmem:[%s120_s0] sm:$0xf]  ;;  %58 = vset.pattern.permute.xlu0 %v85_v1 }
   0x2   :  { %8 = vsyncpa [#allocation3], 0  ;;  %19 = vperm.xlu0 %58, %v16_v0   ;;  %v27_v2 = vld [vmem:[%s121_s1] sm:$0xf]  ;;  %v86_v3 = vmov 839922192  }
   0x3   :  { %v22_v4 = vunpack.c.l.s4 %v86_v3  ;;  %v15_v8 = vld [vmem:[%s122_s2] sm:$0xff]  ;;  %s87_s0 = smov [#allocation2]   ;;  %s46_s21 = sshll.u32 %s123_s3, 4  ;;  %s47_s21 = int_to_ptr.hbm [resolvable:$true] %s46_s21 }
   0x4   :  { %s44_s18 = sshll.u32 %s87_s0, 4  ;;  %s45_s18 = int_to_ptr.vmem [resolvable:$true] %s44_s18 }
   0x5   :  { %v23_v6 = vunpack.c.0.s8 %v22_v4 }
   0xa   :  { %30 = vperm.xlu0 %58, %v27_v2  }
  0x74   :  { %v20_v5 = vpop.permute.xlu0 %19 }
  0x75   :  { %v24_v7 = vperm.slane %v20_v5, %v23_v6 }
  0x77   :  { %v26_v10 = vsub.f32 %v15_v8, %v24_v7 }
  0x7c   :  { %v31_v9 = vpop.permute.xlu0 %30 }
  0x7d   :  { %v35_v11 = vperm.slane %v31_v9, %v23_v6 }
  0x7f   :  { %v37_v12 = vmul.f32 %v35_v11, %v26_v10 }
  0x81   :  { %38 = vst [vmem:[#allocation2] sm:$0xff] %v37_v12 }
  0x82   :  { %49 = dma.vmem_to_hbm [thread:$0]  %s45_s18, 128, %s47_s21, [#allocation3]  }
  0x83   :  { %83 = dma.done.wait [#allocation3], 128  }
  0x84   :  { %84 = vsyncadd [#allocation3], 4294967168 }
  0x85   :  { %54 = vsyncpa [#allocation3], 1 }

</bundles_post_ra>
